<compile_context>
chip_gen: v7x
topology: tpu7x:2x2x1
jax: 0.10.0
libtpu: 0.0.40
codegen_flags: <defaults>
</compile_context>

<pallas_src>
import functools
import math

import jax
import jax.numpy as jnp
from jax.experimental import pallas as pl
from jax.experimental.pallas import tpu as pltpu


_NEG_BIG = -1e30  # large finite negative (avoids exp(-inf - -inf) NaNs)


# ---------------------------------------------------------------------------
# Per-generation tiling / VMEM configuration.
# ---------------------------------------------------------------------------
@functools.lru_cache(maxsize=None)
def _hw_config():
    try:
        cap = pltpu.get_tpu_info().vmem_capacity_bytes
    except Exception:
        cap = 0
    if cap >= 96 * 2**20:      # v5e / v6e: 128 MiB physical VMEM
        return {"tm": 512, "tn": 512, "tk": 1024, "vmem_limit": 80 * 2**20}
    if cap >= 48 * 2**20:      # v7x: 64 MiB physical VMEM
        return {"tm": 256, "tn": 512, "tk": 512, "vmem_limit": 48 * 2**20}
    # Unknown chip / query failed: previously validated conservative config.
    return {"tm": 256, "tn": 256, "tk": 512, "vmem_limit": 32 * 2**20}


# ---------------------------------------------------------------------------
# Tiled matmul + bias kernel (QKV projection and output projection).
# ---------------------------------------------------------------------------
def _matmul_bias_kernel(x_ref, w_ref, b_ref, o_ref, acc_ref):
    @pl.when(pl.program_id(2) == 0)
    def _():
        acc_ref[...] = jnp.zeros_like(acc_ref)

    acc_ref[...] += jnp.dot(
        x_ref[...], w_ref[...], preferred_element_type=jnp.float32
    )

    @pl.when(pl.program_id(2) == pl.num_programs(2) - 1)
    def _():
        o_ref[...] = (acc_ref[...] + b_ref[...].astype(jnp.float32)).astype(o_ref.dtype)


def _round_up(n, m):
    return ((n + m - 1) // m) * m


def _tile_and_pad(n, preferred):
    """Small dims use one full-extent block (always layout-legal); large dims
    use `preferred` and are zero-padded up to a multiple of it."""
    if n <= preferred:
        return n, n
    return preferred, _round_up(n, preferred)


def _pad2d(a, rows, cols):
    pr, pc = rows - a.shape[0], cols - a.shape[1]
    if pr == 0 and pc == 0:
        return a
    return jnp.pad(a, ((0, pr), (0, pc)))


def linear_pallas(x2d, w, b, *, tm=None, tn=None, tk=None, vmem_limit=None):
    """y = x2d @ w + b   (nn.Linear with weight stored as [in, out])."""
    cfg = _hw_config()
    tm = tm or cfg["tm"]
    tn = tn or cfg["tn"]
    tk = tk or cfg["tk"]
    vmem_limit = vmem_limit or cfg["vmem_limit"]

    M, K = x2d.shape
    Kw, N = w.shape
    assert K == Kw and b.shape == (N,)
    out_dtype = x2d.dtype

    tm, Mp = _tile_and_pad(M, tm)
    tn, Np = _tile_and_pad(N, tn)
    tk, Kp = _tile_and_pad(K, tk)

    xp = _pad2d(x2d, Mp, Kp)
    wp = _pad2d(w, Kp, Np)
    bp = _pad2d(b.reshape(1, N), 1, Np)

    grid = (Mp // tm, Np // tn, Kp // tk)
    itemsize = jnp.dtype(out_dtype).itemsize

    out = pl.pallas_call(
        _matmul_bias_kernel,
        out_shape=jax.ShapeDtypeStruct((Mp, Np), out_dtype),
        grid_spec=pltpu.PrefetchScalarGridSpec(
            num_scalar_prefetch=0,
            grid=grid,
            in_specs=[
                pl.BlockSpec((tm, tk), lambda i, j, k: (i, k)),
                pl.BlockSpec((tk, tn), lambda i, j, k: (k, j)),
                pl.BlockSpec((1, tn), lambda i, j, k: (0, j)),
            ],
            out_specs=pl.BlockSpec((tm, tn), lambda i, j, k: (i, j)),
            scratch_shapes=[pltpu.VMEM((tm, tn), jnp.float32)],
        ),
        compiler_params=pltpu.CompilerParams(
            dimension_semantics=("parallel", "parallel", "arbitrary"),
            vmem_limit_bytes=vmem_limit,
        ),
        cost_estimate=pl.CostEstimate(
            flops=2 * Mp * Np * Kp,
            transcendentals=0,
            bytes_accessed=(Mp * Kp + Kp * Np + Mp * Np) * itemsize,
        ),
    )(xp, wp, bp)

    if (Mp, Np) != (M, N):
        out = out[:M, :N]
    return out


# ---------------------------------------------------------------------------
# Flash-style causal attention kernel, all heads per block.
#
# Inputs: the (B, T, 3C) QKV tensor, passed twice:
#   * q-role operand, indexed by the q-tile (resident across the kv axis),
#   * k/v-role operand, indexed by the kv-tile, with the block index clamped
#     at the causal diagonal so upper-triangular blocks are never DMA'd.
# Output: (B, T, C) directly (lane-dense full-C writeback, no transposes).
# Grid: (batch, q-tile, kv-tile); kv-tile is the reduction axis.
# ---------------------------------------------------------------------------
def _causal_attention_kernel(qr_ref, kv_ref, o_ref, q_sc, m_sc, l_sc, acc_sc,
                             *, scale, C, H, D, tq, tkv):
    qi = pl.program_id(1)
    ki = pl.program_id(2)

    @pl.when(ki == 0)
    def _init():
        # Fold 1/sqrt(D) into q once per q-block (not per kv step / per score).
        q_sc[...] = qr_ref[:, 0:C] * scale
        m_sc[...] = jnp.full_like(m_sc, _NEG_BIG)
        l_sc[...] = jnp.zeros_like(l_sc)
        acc_sc[...] = jnp.zeros_like(acc_sc)

    last_needed = (qi * tq + tq - 1) // tkv        # last kv block on/below diag
    should_compute = ki <= last_needed
    needs_mask = ki * tkv + tkv - 1 > qi * tq      # block straddles the diagonal

    def body(apply_mask):
        if apply_mask:
            row = qi * tq + jax.lax.broadcasted_iota(jnp.int32, (tq, tkv), 0)
            col = ki * tkv + jax.lax.broadcasted_iota(jnp.int32, (tq, tkv), 1)
            mask = col > row
        for h in range(H):
            qh = q_sc[:, h * D:(h + 1) * D]                      # (tq, D)
            kh = kv_ref[:, C + h * D: C + (h + 1) * D]           # (tkv, D)
            vh = kv_ref[:, 2 * C + h * D: 2 * C + (h + 1) * D]   # (tkv, D)

            s = jax.lax.dot_general(
                qh, kh, (((1,), (1,)), ((), ())),
                preferred_element_type=jnp.float32)              # (tq, tkv)
            if apply_mask:
                s = jnp.where(mask, _NEG_BIG, s)

            m_prev = m_sc[:, h:h + 1]
            m_new = jnp.maximum(m_prev, jnp.max(s, axis=-1, keepdims=True))
            alpha = jnp.exp(m_prev - m_new)
            p = jnp.exp(s - m_new)

            l_sc[:, h:h + 1] = (alpha * l_sc[:, h:h + 1]
                                + jnp.sum(p, axis=-1, keepdims=True))
            acc_sc[:, h * D:(h + 1) * D] = (
                alpha * acc_sc[:, h * D:(h + 1) * D]
                + jax.lax.dot_general(p.astype(vh.dtype), vh,
                                      (((1,), (0,)), ((), ())),
                                      preferred_element_type=jnp.float32))
            m_sc[:, h:h + 1] = m_new

    # Diagonal blocks: build + apply the causal mask.
    @pl.when(jnp.logical_and(should_compute, needs_mask))
    def _():
        body(True)

    # Fully visible blocks: no mask work at all.
    @pl.when(jnp.logical_and(should_compute, jnp.logical_not(needs_mask)))
    def _():
        body(False)

    @pl.when(ki == pl.num_programs(2) - 1)
    def _finalize():
        for h in range(H):
            inv = pl.reciprocal(l_sc[:, h:h + 1], approx=True)   # EUP, not VALU div
            o_ref[:, h * D:(h + 1) * D] = (
                acc_sc[:, h * D:(h + 1) * D] * inv).astype(o_ref.dtype)


def _seq_tile(T, preferred):
    if T <= preferred:
        return T
    if T % preferred == 0:
        return preferred
    return T  # full-extent fallback (always layout-legal)


def causal_attention_pallas(qkv, *, n_head, tq=128, tkv=256, vmem_limit=None):
    """Causal multi-head attention on a fused (B, T, 3C) QKV tensor.

    Column layout matches nn.Linear(C, 3C) + PyTorch head split:
    [q_h0 .. q_h{H-1} | k_h0 .. | v_h0 ..] with D columns per head.
    Returns (B, T, C) with heads re-merged (no transposes needed).
    """
    B, T, C3 = qkv.shape
    C = C3 // 3
    H = n_head
    D = C // H
    scale = 1.0 / math.sqrt(D)
    tq = _seq_tile(T, tq)
    tkv = _seq_tile(T, tkv)
    nq, nkv = T // tq, T // tkv
    if vmem_limit is None:
        vmem_limit = _hw_config()["vmem_limit"]
    itemsize = jnp.dtype(qkv.dtype).itemsize

    kernel = functools.partial(_causal_attention_kernel,
                               scale=scale, C=C, H=H, D=D, tq=tq, tkv=tkv)

    return pl.pallas_call(
        kernel,
        out_shape=jax.ShapeDtypeStruct((B, T, C), qkv.dtype),
        grid_spec=pltpu.PrefetchScalarGridSpec(
            num_scalar_prefetch=0,
            grid=(B, nq, nkv),
            in_specs=[
                # q role: same block across the kv axis -> fetched once per (b, qi).
                pl.BlockSpec((pl.Squeezed(), tq, C3),
                             lambda b, qi, ki: (b, qi, 0)),
                # k/v role: clamp at the causal diagonal so blocks above it are
                # never DMA'd (their compute is skipped by pl.when as well).
                pl.BlockSpec((pl.Squeezed(), tkv, C3),
                             lambda b, qi, ki:
                             (b, jnp.minimum(ki, (qi * tq + tq - 1) // tkv), 0)),
            ],
            out_specs=pl.BlockSpec((pl.Squeezed(), tq, C),
                                   lambda b, qi, ki: (b, qi, 0)),
            scratch_shapes=[
                pltpu.VMEM((tq, C), qkv.dtype),     # pre-scaled q (all heads)
                pltpu.VMEM((tq, H), jnp.float32),   # running max per head
                pltpu.VMEM((tq, H), jnp.float32),   # running denominator per head
                pltpu.VMEM((tq, C), jnp.float32),   # output accumulator (all heads)
            ],
        ),
        compiler_params=pltpu.CompilerParams(
            dimension_semantics=("parallel", "parallel", "arbitrary"),
            vmem_limit_bytes=vmem_limit,
        ),
        cost_estimate=pl.CostEstimate(
            flops=2 * B * T * T * C,                 # causal ~= half of dense
            transcendentals=B * H * T * T // 2,
            bytes_accessed=(B * T * C3 + B * nq * T * C3 // 2 + B * T * C) * itemsize,
        ),
    )(qkv, qkv)


# ---------------------------------------------------------------------------
# Full module forward (eval mode).
# ---------------------------------------------------------------------------
def causal_self_attention(x, w_attn, b_attn, w_proj, b_proj, *, n_head):
    B, T, C = x.shape
    assert C % n_head == 0

    # QKV projection: nn.Linear(C, 3C); weights stored [in, out].
    qkv = linear_pallas(x.reshape(B * T, C), w_attn, b_attn)    # (B*T, 3C)
    qkv = qkv.reshape(B, T, 3 * C)                              # free reshape

    # Causal scaled-dot-product attention; head split/merge happens inside
    # the kernel (static lane slices) -> no HBM transposes. Output is (B,T,C).
    y = causal_attention_pallas(qkv, n_head=n_head)

    # Output projection: nn.Linear(C, C).
    y = linear_pallas(y.reshape(B * T, C), w_proj, b_proj).reshape(B, T, C)
    # TODO(synk): attn_dropout / resid_dropout omitted (eval-mode forward, dropout_p=0).
    return y


def causal_self_attention_reference(x, w_attn, b_attn, w_proj, b_proj, *, n_head):
    B, T, C = x.shape
    D = C // n_head
    qkv = jnp.dot(x, w_attn, precision="highest") + b_attn
    q, k, v = jnp.split(qkv, 3, axis=-1)
    q = q.reshape(B, T, n_head, D).transpose(0, 2, 1, 3)
    k = k.reshape(B, T, n_head, D).transpose(0, 2, 1, 3)
    v = v.reshape(B, T, n_head, D).transpose(0, 2, 1, 3)
    s = jnp.einsum("bhqd,bhkd->bhqk", q, k, precision="highest") / math.sqrt(D)
    mask = jnp.tril(jnp.ones((T, T), dtype=bool))
    s = jnp.where(mask[None, None], s, -jnp.inf)
    p = jax.nn.softmax(s, axis=-1)
    y = jnp.einsum("bhqk,bhkd->bhqd", p, v, precision="highest")
    y = y.transpose(0, 2, 1, 3).reshape(B, T, C)
    return jnp.dot(y, w_proj, precision="highest") + b_proj


if __name__ == "__main__":
    batch, seq, hidden, n_head = 2, 8, 32, 4
    block_size = 8
    assert seq <= block_size

    key = jax.random.PRNGKey(0)
    kx, kw0, kb0, kw1, kb1 = jax.random.split(key, 5)
    x = jax.random.normal(kx, (batch, seq, hidden), dtype=jnp.float32)
    w_attn = 0.1 * jax.random.normal(kw0, (hidden, 3 * hidden), dtype=jnp.float32)
    b_attn = 0.1 * jax.random.normal(kb0, (3 * hidden,), dtype=jnp.float32)
    w_proj = 0.1 * jax.random.normal(kw1, (hidden, hidden), dtype=jnp.float32)
    b_proj = 0.1 * jax.random.normal(kb1, (hidden,), dtype=jnp.float32)

    out = causal_self_attention(x, w_attn, b_attn, w_proj, b_proj, n_head=n_head)
    out = jax.block_until_ready(out)

    ref = causal_self_attention_reference(
        x, w_attn, b_attn, w_proj, b_proj, n_head=n_head)

    assert out.shape == (batch, seq, hidden)
    max_err = jnp.max(jnp.abs(out - ref))
    assert jnp.allclose(out, ref, atol=2e-2, rtol=2e-2), (
        f"mismatch vs reference: max abs err = {max_err}")

    print("KERNEL_OK")
</pallas_src>

<mosaic_0001>
module attributes {stable_mosaic.version = 11 : i64} {
  func.func @_matmul_bias_kernel(%arg0: i32, %arg1: i32, %arg2: i32, %arg3: memref<16x32xf32, #tpu.memory_space<vmem>>, %arg4: memref<32x96xf32, #tpu.memory_space<vmem>>, %arg5: memref<1x96xf32, #tpu.memory_space<vmem>>, %arg6: memref<16x96xf32, #tpu.memory_space<vmem>>, %arg7: memref<16x96xf32, #tpu.memory_space<vmem>>) attributes {dimension_semantics = [#tpu.dimension_semantics<parallel>, #tpu.dimension_semantics<parallel>, #tpu.dimension_semantics<arbitrary>], iteration_bounds = array<i64: 1, 1, 1>, scalar_prefetch = 0 : i64, scratch_operands = 1 : i64, tpu.core_type = #tpu.core_type<tc>, window_params = [{transform_indices = @transform_0, window_bounds = array<i64: 16, 32>}, {transform_indices = @transform_1, window_bounds = array<i64: 32, 96>}, {transform_indices = @transform_2, window_bounds = array<i64: 1, 96>}, {transform_indices = @transform_3, window_bounds = array<i64: 16, 96>}]} {
    %c0_i32 = arith.constant 0 : i32
    %0 = arith.cmpi eq, %arg2, %c0_i32 : i32
    %1 = arith.extui %0 : i1 to i32
    %c0_i32_0 = arith.constant 0 : i32
    %2 = arith.cmpi ne, %1, %c0_i32_0 : i32
    scf.if %2 {
      %cst_10 = arith.constant 0.000000e+00 : f32
      %12 = vector.broadcast %cst_10 : f32 to vector<16x96xf32>
      %c0_11 = arith.constant 0 : index
      %c0_12 = arith.constant 0 : index
      %13 = vector.load %arg7[%c0_11, %c0_12] : memref<16x96xf32, #tpu.memory_space<vmem>>, vector<16x96xf32>
      tpu.vector_store %arg7[%c0_11, %c0_12], %12 {strides = array<i32>} : memref<16x96xf32, #tpu.memory_space<vmem>>, vector<16x96xf32>,
    } else {
    }
    %c0 = arith.constant 0 : index
    %c0_1 = arith.constant 0 : index
    %3 = vector.load %arg7[%c0, %c0_1] : memref<16x96xf32, #tpu.memory_space<vmem>>, vector<16x96xf32>
    %c0_2 = arith.constant 0 : index
    %c0_3 = arith.constant 0 : index
    %4 = vector.load %arg3[%c0_2, %c0_3] : memref<16x32xf32, #tpu.memory_space<vmem>>, vector<16x32xf32>
    %c0_4 = arith.constant 0 : index
    %c0_5 = arith.constant 0 : index
    %5 = vector.load %arg4[%c0_4, %c0_5] : memref<32x96xf32, #tpu.memory_space<vmem>>, vector<32x96xf32>
    %cst = arith.constant dense<0.000000e+00> : vector<16x96xf32>
    %6 = tpu.matmul %4, %5, %cst {dimension_numbers = #tpu.dot_dimension_numbers<[1], [0], [0], [1], [0, 0, 1, 1], [], []>} : vector<16x32xf32>, vector<32x96xf32>, vector<16x96xf32> -> vector<16x96xf32>
    %7 = arith.addf %3, %6 : vector<16x96xf32>
    %c0_6 = arith.constant 0 : index
    %c0_7 = arith.constant 0 : index
    %8 = vector.load %arg7[%c0_6, %c0_7] : memref<16x96xf32, #tpu.memory_space<vmem>>, vector<16x96xf32>
    tpu.vector_store %arg7[%c0_6, %c0_7], %7 {strides = array<i32>} : memref<16x96xf32, #tpu.memory_space<vmem>>, vector<16x96xf32>,
    %c0_i32_8 = arith.constant 0 : i32
    %9 = arith.cmpi eq, %arg2, %c0_i32_8 : i32
    %10 = arith.extui %9 : i1 to i32
    %c0_i32_9 = arith.constant 0 : i32
    %11 = arith.cmpi ne, %10, %c0_i32_9 : i32
    scf.if %11 {
      %c0_10 = arith.constant 0 : index
      %c0_11 = arith.constant 0 : index
      %12 = vector.load %arg7[%c0_10, %c0_11] : memref<16x96xf32, #tpu.memory_space<vmem>>, vector<16x96xf32>
      %c0_12 = arith.constant 0 : index
      %c0_13 = arith.constant 0 : index
      %13 = vector.load %arg5[%c0_12, %c0_13] : memref<1x96xf32, #tpu.memory_space<vmem>>, vector<1x96xf32>
      %14 = vector.broadcast %13 : vector<1x96xf32> to vector<16x96xf32>
      %15 = arith.addf %12, %14 : vector<16x96xf32>
      %c0_14 = arith.constant 0 : index
      %c0_15 = arith.constant 0 : index
      %16 = vector.load %arg6[%c0_14, %c0_15] : memref<16x96xf32, #tpu.memory_space<vmem>>, vector<16x96xf32>
      tpu.vector_store %arg6[%c0_14, %c0_15], %15 {strides = array<i32>} : memref<16x96xf32, #tpu.memory_space<vmem>>, vector<16x96xf32>,
    } else {
    }
    return
  }
  func.func @transform_0(%arg0: i32, %arg1: i32, %arg2: i32) -> (i32, i32) {
    %c0_i32 = arith.constant 0 : i32
    return %arg0, %arg2 : i32, i32
  }
  func.func @transform_1(%arg0: i32, %arg1: i32, %arg2: i32) -> (i32, i32) {
    %c0_i32 = arith.constant 0 : i32
    return %arg2, %arg1 : i32, i32
  }
  func.func @transform_2(%arg0: i32, %arg1: i32, %arg2: i32) -> (i32, i32) {
    %c0_i32 = arith.constant 0 : i32
    %c0_i32_0 = arith.constant 0 : i32
    return %c0_i32, %arg1 : i32, i32
  }
  func.func @transform_3(%arg0: i32, %arg1: i32, %arg2: i32) -> (i32, i32) {
    %c0_i32 = arith.constant 0 : i32
    return %arg0, %arg1 : i32, i32
  }
}

</mosaic_0001>

<bundles_post_ra>
// kernel: tpu_custom_call.1
= control target key start
LH: loop header
LB: loop body
LE: loop exit
PB: predicated region body
PF: predicated region fallthrough
CT: control target
= control target key end

     0   :  { %8 = vsyncpa [#allocation4], 0  ;;  %s365_s0 = inlined_call_operand.hbm [shape: f32[16,32], index: 0, kind: input, shape index: {}]   ;;  %s366_s1 = inlined_call_operand.hbm [shape: f32[32,96], index: 1, kind: input, shape index: {}]   ;;  %s367_s2 = inlined_call_operand.vmem [shape: f32[1,96], index: 2, kind: input, shape index: {}]   ;;  %s368_s3 = inlined_call_operand.hbm [shape: f32[16,96], index: 3, kind: output, shape index: {}]  }
   0x1   :  { %9 = vsyncpa [#allocation7], 0 }
   0x2   :  { %10 = vsyncpa [#allocation5], 0  ;;  %s285_s12 = smov [#allocation3]   ;;  %s213_s16 = scalar_lea.hbm %s365_s0, 256 }
   0x3   :  { %s16_s13 = sshll.u32 %s285_s12, 4  ;;  %p214_p0 = scmp.ne.s32.totalorder %s365_s0, %s213_s16  ;;  %s17_s13 = int_to_ptr.vmem [resolvable:$true] %s16_s13 }
   0x4   :  { %p217_p1 = scmp.lt.u32.totalorder %s213_s16, %s365_s0 }
   0x6   :  { %p219_p2 = pnand %p217_p1, %p214_p0 }
   0x8   :  { %222 = shalt.err (!%p219_p2)
}
   0x9   :  { %s223_s21 = scalar_lea.vmem %s17_s13, 256  ;;  %p228_p4 = scmp.lt.s32.totalorder %s17_s13, %s17_s13 }
   0xa   :  { %p224_p3 = scmp.ne.s32.totalorder %s17_s13, %s223_s21  ;;  %p229_p5 = scmp.lt.s32.totalorder %s223_s21, %s223_s21 }
   0xc   :  { %p230_p6 = por %p229_p5, %p228_p4 }
   0xe   :  { %p231_p7 = pnand %p230_p6, %p224_p3 }
  0x10   :  { %234 = shalt.err (!%p231_p7)
}
  0x11   :  { %s286_s22 = smov 128   ;;  %s287_s23 = smov 8  }
  0x12   :  { %22 = dma.hbm_to_vmem [thread:$0]  %s365_s0, 256, %s17_s13, [#allocation4], %s286_s22, %s286_s22, %s287_s23  }
  0x13   :  { %s288_s26 = smov [#allocation6]   ;;  %s235_s30 = scalar_lea.hbm %s366_s1, 512 }
  0x14   :  { %s28_s27 = sshll.u32 %s288_s26, 4  ;;  %p236_p8 = scmp.ne.s32.totalorder %s366_s1, %s235_s30  ;;  %s29_s27 = int_to_ptr.vmem [resolvable:$true] %s28_s27 }
  0x15   :  { %p239_p9 = scmp.lt.u32.totalorder %s235_s30, %s366_s1 }
  0x17   :  { %p241_p10 = pnand %p239_p9, %p236_p8 }
  0x19   :  { %244 = shalt.err (!%p241_p10)
}
  0x1a   :  { %s245_s8 = scalar_lea.vmem %s29_s27, 512  ;;  %p250_p12 = scmp.lt.s32.totalorder %s29_s27, %s29_s27 }
  0x1b   :  { %p246_p11 = scmp.ne.s32.totalorder %s29_s27, %s245_s8  ;;  %p251_p13 = scmp.lt.s32.totalorder %s245_s8, %s245_s8 }
  0x1d   :  { %p252_p0 = por %p251_p13, %p250_p12 }
  0x1f   :  { %p253_p1 = pnand %p252_p0, %p246_p11 }
  0x21   :  { %256 = shalt.err (!%p253_p1)
}
  0x22   :  { %34 = dma.hbm_to_vmem [thread:$0]  %s366_s1, 512, %s29_s27, [#allocation7], %s286_s22, %s286_s22, %s287_s23  }
  0x23   :  { %279 = dma.done.wait [#allocation4], 256  }
  0x24   :  { %280 = vsyncadd [#allocation4], 4294967040 }
  0x25   :  { %281 = dma.done.wait [#allocation7], 512  }
  0x26   :  { %282 = vsyncadd [#allocation7], 4294966784  ;;  %vm47_vm0 = vcmask 785408   ;;  %v289_v0 = vmov 0.0   ;;  %vm58_vm1 = vcmask 261120   ;;  %v54_v1 = vld [vmem:[#allocation6] sm:$0xff] }
  0x27   :  { %49 = vst.msk [vmem:[#allocation2 + $0x8] sm:$0xff] %vm47_vm0, %v289_v0  ;;  %48 = vst.msk [vmem:[#allocation2] sm:$0xff] %vm47_vm0, %v289_v0  ;;  %v55_v2 = vld [vmem:[#allocation6 + $0x8] sm:$0xff]  ;;  %v56_v3 = vld [vmem:[#allocation6 + $0x10] sm:$0xff]  ;;  %s290_s11 = smov [#allocation8]  }
  0x28   :  { %v199_v4 = vpack.c.bf16 %v55_v2, %v54_v1  ;;  %v57_v5 = vld [vmem:[#allocation6 + $0x18] sm:$0xff]  ;;  %v52_v6 = vld [vmem:[#allocation3] sm:$0xff]  ;;  %v181_v15 = vld [vmem:[%s367_s2] ss:$0 sm:$0xff]  ;;  %s166_s12 = sshll.u32 %s290_s11, 4  ;;  %s167_s12 = int_to_ptr.vmem [resolvable:$true] %s166_s12 }
  0x29   :  { %v203_v7 = vpack.c.bf16 %v57_v5, %v56_v3  ;;  %196 = vmatprep.mubr.msk.f32.mxu0 %vm58_vm1, %v52_v6  ;;  %v53_v8 = vld [vmem:[#allocation3 + $0x8] sm:$0xff]  ;;  %s257_s13 = scalar_lea.vmem %s167_s12, 256  ;;  %p262_p3 = scmp.lt.s32.totalorder %s167_s12, %s167_s12 }
  0x2a   :  { %200 = vmatprep.subr.bf16.mxu0 %v199_v4  ;;  %p258_p2 = scmp.ne.s32.totalorder %s167_s12, %s257_s13  ;;  %p263_p4 = scmp.lt.s32.totalorder %s257_s13, %s257_s13 }
  0x2b   :  { %202 = vmatpush3.bf16.msra.mxu0 %v199_v4 }
  0x2c   :  { %204 = vmatprep.subr.bf16.mxu0 %v203_v7  ;;  %p264_p5 = por %p263_p4, %p262_p3 }
  0x2e   :  { %v51_v9 = vld [vmem:[#allocation2 + $0x8] sm:$0xff]  ;;  %v50_v10 = vld [vmem:[#allocation2] sm:$0xff]  ;;  %p265_p6 = pnand %p264_p5, %p258_p2 }
  0x2f   :  { %206 = vmatpush3.bf16.msra.mxu0 %v203_v7 }
  0x32   :  { %197 = vmatmul.mubr.msk.f32.vlgmr.msra.gmra.mrb[0].mxu0 %vm58_vm1, %v53_v8 }
 0x105   :  { %v198_v11 = vpop.f32.mrb[0].mxu0 }
 0x106   :  { %v141_v12 = vadd.f32 %v198_v11, %v51_v9  ;;  %v131_v13 = vpop.f32.mrb[1].mxu0 }
 0x107   :  { %v140_v14 = vadd.f32 %v131_v13, %v50_v10 }
 0x108   :  { %144 = vst.msk [vmem:[#allocation2 + $0x8] sm:$0xff] %vm47_vm0, %v141_v12 }
 0x109   :  { %143 = vst.msk [vmem:[#allocation2] sm:$0xff] %vm47_vm0, %v140_v14 }
 0x10f   :  { %v149_v16 = vld [vmem:[#allocation2 + $0x8] sm:$0xff] }
 0x110   :  { %v148_v17 = vld [vmem:[#allocation2] sm:$0xff]  ;;  %v158_v18 = vadd.f32 %v181_v15, %v149_v16 }
 0x111   :  { %v157_v19 = vadd.f32 %v181_v15, %v148_v17 }
 0x112   :  { %160 = vst.msk [vmem:[#allocation8 + $0x8] sm:$0xff] %vm47_vm0, %v158_v18 }
 0x113   :  { %159 = vst.msk [vmem:[#allocation8] sm:$0xff] %vm47_vm0, %v157_v19 }
 0x114   :  { %268 = shalt.err (!%p265_p6)
}
 0x115   :  { %s269_s15 = scalar_lea.hbm %s368_s3, 256 }
 0x116   :  { %p270_p7 = scmp.ne.s32.totalorder %s368_s3, %s269_s15  ;;  %p273_p8 = scmp.lt.u32.totalorder %s269_s15, %s368_s3 }
 0x118   :  { %p275_p9 = pnand %p273_p8, %p270_p7 }
 0x11a   :  { %278 = shalt.err (!%p275_p9)
}
 0x11b   :  { %172 = dma.vmem_to_hbm [thread:$0]  %s167_s12, 256, %s368_s3, [#allocation5], %s286_s22, %s286_s22, %s287_s23  }
 0x11c   :  { %283 = dma.done.wait [#allocation5], 256  }
 0x11d   :  { %284 = vsyncadd [#allocation5], 4294967040 }
 0x11e   :  { %176 = vsyncpa [#allocation4], 1 }
 0x11f   :  { %177 = vsyncpa [#allocation7], 1 }
 0x120   :  { %178 = vsyncpa [#allocation5], 1 }

</bundles_post_ra>
